<compile_context>
chip_gen: v7x
topology: tpu7x:2x2x1
jax: 0.10.0
libtpu: 0.0.40
codegen_flags: <defaults>
</compile_context>

<pallas_src>
import functools

import jax
import jax.numpy as jnp
from jax import lax
from jax.experimental import pallas as pl
from jax.experimental.pallas import tpu as pltpu


def _round_up(x, m):
    return (x + m - 1) // m * m


def _pwce_kernel(x_ref, t_ref, w_ref, cw_ref, out_ref, *, s_total):
    """One (batch n, lane-tile t) step of the pixel-wise weighted CE sum.

    x_ref  : (1, C, T)  logits block
    t_ref  : (1, 1, T)  integer class labels
    w_ref  : (1, 1, T)  per-pixel weights
    cw_ref : (C, 1)     per-class weights (resident, index_map constant)
    out_ref: (1, 1, T)  per-lane accumulator for this batch element
    """
    t_idx = pl.program_id(1)

    @pl.when(t_idx == 0)
    def _():
        out_ref[...] = jnp.zeros_like(out_ref)

    x = x_ref[0].astype(jnp.float32)        # (C, T)
    tgt = t_ref[0].astype(jnp.int32)        # (1, T)
    w = w_ref[0].astype(jnp.float32)        # (1, T)
    cw = cw_ref[...].astype(jnp.float32)    # (C, 1)

    c, tile = x.shape

    # Lane-validity mask for the (possibly ragged) last tile.  Zeroing the
    # per-pixel weight kills the contribution; zeroing x keeps the
    # log-sum-exp finite even if the padded region held garbage.
    lane = lax.broadcasted_iota(jnp.int32, (1, tile), 1)
    valid = (t_idx * tile + lane) < s_total          # (1, T)
    x = jnp.where(valid, x, 0.0)
    w = jnp.where(valid, w, 0.0)

    # Numerically stable log-sum-exp over the channel (sublane) axis.
    m = jnp.max(x, axis=0, keepdims=True)                              # (1, T)
    xs = x - m                                                         # (C, T)
    lse = jnp.log(jnp.sum(jnp.exp(xs), axis=0, keepdims=True))         # (1, T)

    # Select the target-class shifted logit and class weight per lane.
    c_idx = lax.broadcasted_iota(jnp.int32, (c, tile), 0)
    onehot = tgt == c_idx                                              # (C, T) bool
    x_sel = jnp.sum(jnp.where(onehot, xs, 0.0), axis=0, keepdims=True)  # (1, T)
    cw_sel = jnp.sum(jnp.where(onehot, cw, 0.0), axis=0, keepdims=True)  # (1, T)

    # -log_softmax(x)[target] = lse - xs[target]
    nll = lse - x_sel                                                  # (1, T)
    out_ref[...] += (w * cw_sel * nll)[None]                           # (1, 1, T)


@functools.partial(jax.jit, static_argnames=("lane_tile",))
def pixelwise_cross_entropy_loss(logits, target, weights, class_weights=None,
                                 lane_tile=2048):
    """result.mean() of  -class_weights * weights * onehot(target) * log_softmax(logits)."""
    N, C = logits.shape[0], logits.shape[1]
    S = 1
    for d in logits.shape[2:]:
        S *= d

    # Free reshapes (merge trailing dims / insert unit dim) -- no HBM copies.
    x = logits.reshape(N, C, S)
    t = target.reshape(N, 1, S).astype(jnp.int32)
    w = weights.reshape(N, 1, S)
    if class_weights is None:
        cw = jnp.ones((C, 1), jnp.float32)
    else:
        cw = jnp.asarray(class_weights, jnp.float32).reshape(C, 1)

    tile = min(_round_up(lane_tile, 128), _round_up(S, 128))
    nt = pl.cdiv(S, tile)

    partial = pl.pallas_call(
        functools.partial(_pwce_kernel, s_total=S),
        out_shape=jax.ShapeDtypeStruct((N, 1, tile), jnp.float32),
        grid=(N, nt),
        in_specs=[
            pl.BlockSpec((1, C, tile), lambda n, s: (n, 0, s)),
            pl.BlockSpec((1, 1, tile), lambda n, s: (n, 0, s)),
            pl.BlockSpec((1, 1, tile), lambda n, s: (n, 0, s)),
            pl.BlockSpec((C, 1), lambda n, s: (0, 0)),
        ],
        out_specs=pl.BlockSpec((1, 1, tile), lambda n, s: (n, 0, 0)),
        compiler_params=pltpu.CompilerParams(
            dimension_semantics=("parallel", "arbitrary")),
    )(x, t, w, cw)

    # Final reduction of N*tile floats + mean over the full result tensor.
    return jnp.sum(partial) / (N * C * S)


def reference_loss(logits, target, weights, class_weights=None):
    """Pure-jnp mirror of the torch forward (ignore_index=None path)."""
    C = logits.shape[1]
    logp = jax.nn.log_softmax(logits, axis=1)
    onehot = jax.nn.one_hot(target, C, axis=1, dtype=jnp.float32)
    w = jnp.expand_dims(weights, 1)
    if class_weights is None:
        cw = jnp.ones((C,), jnp.float32)
    else:
        cw = jnp.asarray(class_weights, jnp.float32)
    cw = cw.reshape((1, C) + (1,) * (logits.ndim - 2))
    result = -(cw * w) * onehot * logp
    return jnp.mean(result)


if __name__ == "__main__":
    key = jax.random.PRNGKey(0)
    k1, k2, k3 = jax.random.split(key, 3)

    # 5-D input (N, C, D, H, W): class_weights.view(1,-1,1,1,1) in the module
    # implies volumetric data; target/weights are (N, D, H, W).
    N, C, D, H, W = 2, 4, 4, 16, 16
    logits = jax.random.normal(k1, (N, C, D, H, W), jnp.float32)
    target = jax.random.randint(k2, (N, D, H, W), 0, C, jnp.int32)
    weights = jax.random.uniform(k3, (N, D, H, W), jnp.float32, 0.1, 2.0)
    class_weights = jnp.array([1.0, 2.0, 0.5, 1.5], jnp.float32)

    loss = pixelwise_cross_entropy_loss(logits, target, weights, class_weights)
    loss = jax.block_until_ready(loss)

    ref = reference_loss(logits, target, weights, class_weights)
    a, b = float(loss), float(ref)
    assert abs(a - b) <= 1e-5 * (1.0 + abs(b)), (a, b)

    # Also exercise the default class_weights=None path and a ragged lane tile.
    loss2 = pixelwise_cross_entropy_loss(logits, target, weights, None,
                                         lane_tile=384)
    ref2 = reference_loss(logits, target, weights, None)
    a2, b2 = float(jax.block_until_ready(loss2)), float(ref2)
    assert abs(a2 - b2) <= 1e-5 * (1.0 + abs(b2)), (a2, b2)

    print("KERNEL_OK")
</pallas_src>

<mosaic_0001>
module attributes {stable_mosaic.version = 11 : i64} {
  func.func @_pwce_kernel(%arg0: i32, %arg1: i32, %arg2: memref<1x4x1024xf32, #tpu.memory_space<vmem>>, %arg3: memref<1x1x1024xi32, #tpu.memory_space<vmem>>, %arg4: memref<1x1x1024xf32, #tpu.memory_space<vmem>>, %arg5: memref<4x1xf32, #tpu.memory_space<vmem>>, %arg6: memref<1x1x1024xf32, #tpu.memory_space<vmem>>) attributes {dimension_semantics = [#tpu.dimension_semantics<parallel>, #tpu.dimension_semantics<arbitrary>], iteration_bounds = array<i64: 2, 1>, scalar_prefetch = 0 : i64, scratch_operands = 0 : i64, tpu.core_type = #tpu.core_type<tc>, window_params = [{transform_indices = @transform_0, window_bounds = array<i64: 1, 4, 1024>}, {transform_indices = @transform_1, window_bounds = array<i64: 1, 1, 1024>}, {transform_indices = @transform_2, window_bounds = array<i64: 1, 1, 1024>}, {pipeline_mode = #tpu.pipeline_mode<synchronous>, transform_indices = @transform_3, window_bounds = array<i64: 4, 1>}, {transform_indices = @transform_4, window_bounds = array<i64: 1, 1, 1024>}]} {
    %c0_i32 = arith.constant 0 : i32
    %0 = arith.cmpi eq, %arg1, %c0_i32 : i32
    %1 = arith.extui %0 : i1 to i32
    %c0_i32_0 = arith.constant 0 : i32
    %2 = arith.cmpi ne, %1, %c0_i32_0 : i32
    scf.if %2 {
      %cst_25 = arith.constant 0.000000e+00 : f32
      %50 = vector.broadcast %cst_25 : f32 to vector<1x1x1024xf32>
      %c0_26 = arith.constant 0 : index
      %c0_27 = arith.constant 0 : index
      %c0_28 = arith.constant 0 : index
      %51 = vector.load %arg6[%c0_26, %c0_27, %c0_28] : memref<1x1x1024xf32, #tpu.memory_space<vmem>>, vector<1x1x1024xf32>
      tpu.vector_store %arg6[%c0_26, %c0_27, %c0_28], %50 {strides = array<i32>} : memref<1x1x1024xf32, #tpu.memory_space<vmem>>, vector<1x1x1024xf32>,
    } else {
    }
    %c0 = arith.constant 0 : index
    %c0_1 = arith.constant 0 : index
    %c0_2 = arith.constant 0 : index
    %3 = vector.load %arg2[%c0, %c0_1, %c0_2] : memref<1x4x1024xf32, #tpu.memory_space<vmem>>, vector<1x4x1024xf32>
    %4 = vector.shape_cast %3 : vector<1x4x1024xf32> to vector<4x1024xf32>
    %c0_3 = arith.constant 0 : index
    %c0_4 = arith.constant 0 : index
    %c0_5 = arith.constant 0 : index
    %5 = vector.load %arg3[%c0_3, %c0_4, %c0_5] : memref<1x1x1024xi32, #tpu.memory_space<vmem>>, vector<1x1x1024xi32>
    %6 = vector.shape_cast %5 : vector<1x1x1024xi32> to vector<1x1024xi32>
    %c0_6 = arith.constant 0 : index
    %c0_7 = arith.constant 0 : index
    %c0_8 = arith.constant 0 : index
    %7 = vector.load %arg4[%c0_6, %c0_7, %c0_8] : memref<1x1x1024xf32, #tpu.memory_space<vmem>>, vector<1x1x1024xf32>
    %8 = vector.shape_cast %7 : vector<1x1x1024xf32> to vector<1x1024xf32>
    %c0_9 = arith.constant 0 : index
    %c0_10 = arith.constant 0 : index
    %9 = vector.load %arg5[%c0_9, %c0_10] : memref<4x1xf32, #tpu.memory_space<vmem>>, vector<4x1xf32>
    %10 = tpu.iota {dimensions = array<i32: 1>} : vector<1x1024xi32>
    %c1024_i32 = arith.constant 1024 : i32
    %11 = arith.muli %arg1, %c1024_i32 : i32
    %12 = vector.broadcast %11 : i32 to vector<1x1024xi32>
    %13 = arith.addi %12, %10 : vector<1x1024xi32>
    %c1024_i32_11 = arith.constant 1024 : i32
    %14 = vector.broadcast %c1024_i32_11 : i32 to vector<1x1024xi32>
    %15 = arith.cmpi slt, %13, %14 : vector<1x1024xi32>
    %cst = arith.constant 0.000000e+00 : f32
    %16 = vector.shape_cast %15 : vector<1x1024xi1> to vector<1x1024xi1>
    %17 = vector.broadcast %16 : vector<1x1024xi1> to vector<4x1024xi1>
    %18 = vector.broadcast %cst : f32 to vector<4x1024xf32>
    %19 = arith.select %17, %4, %18 : vector<4x1024xi1>, vector<4x1024xf32>
    %cst_12 = arith.constant 0.000000e+00 : f32
    %20 = vector.broadcast %cst_12 : f32 to vector<1x1024xf32>
    %21 = arith.select %15, %8, %20 : vector<1x1024xi1>, vector<1x1024xf32>
    %cst_13 = arith.constant dense<0xFF800000> : vector<1024xf32>
    %22 = vector.multi_reduction <maximumf>, %19, %cst_13 [0] : vector<4x1024xf32> to vector<1024xf32>
    %23 = vector.shape_cast %22 : vector<1024xf32> to vector<1x1024xf32>
    %24 = vector.broadcast %23 : vector<1x1024xf32> to vector<4x1024xf32>
    %25 = arith.subf %19, %24 : vector<4x1024xf32>
    %26 = math.exp %25 : vector<4x1024xf32>
    %cst_14 = arith.constant dense<0.000000e+00> : vector<1024xf32>
    %27 = vector.multi_reduction <add>, %26, %cst_14 [0] : vector<4x1024xf32> to vector<1024xf32>
    %28 = vector.shape_cast %27 : vector<1024xf32> to vector<1x1024xf32>
    %29 = math.log %28 : vector<1x1024xf32>
    %30 = tpu.iota {dimensions = array<i32: 0>} : vector<4x1024xi32>
    %31 = vector.broadcast %6 : vector<1x1024xi32> to vector<4x1024xi32>
    %32 = arith.cmpi eq, %31, %30 : vector<4x1024xi32>
    %cst_15 = arith.constant 0.000000e+00 : f32
    %33 = vector.broadcast %cst_15 : f32 to vector<4x1024xf32>
    %34 = arith.select %32, %25, %33 : vector<4x1024xi1>, vector<4x1024xf32>
    %cst_16 = arith.constant dense<0.000000e+00> : vector<1024xf32>
    %35 = vector.multi_reduction <add>, %34, %cst_16 [0] : vector<4x1024xf32> to vector<1024xf32>
    %36 = vector.shape_cast %35 : vector<1024xf32> to vector<1x1024xf32>
    %cst_17 = arith.constant 0.000000e+00 : f32
    %37 = vector.shape_cast %9 : vector<4x1xf32> to vector<4x1xf32>
    %38 = vector.broadcast %37 : vector<4x1xf32> to vector<4x1024xf32>
    %39 = vector.broadcast %cst_17 : f32 to vector<4x1024xf32>
    %40 = arith.select %32, %38, %39 : vector<4x1024xi1>, vector<4x1024xf32>
    %cst_18 = arith.constant dense<0.000000e+00> : vector<1024xf32>
    %41 = vector.multi_reduction <add>, %40, %cst_18 [0] : vector<4x1024xf32> to vector<1024xf32>
    %42 = vector.shape_cast %41 : vector<1024xf32> to vector<1x1024xf32>
    %43 = arith.subf %29, %36 : vector<1x1024xf32>
    %c0_19 = arith.constant 0 : index
    %c0_20 = arith.constant 0 : index
    %c0_21 = arith.constant 0 : index
    %44 = vector.load %arg6[%c0_19, %c0_20, %c0_21] : memref<1x1x1024xf32, #tpu.memory_space<vmem>>, vector<1x1x1024xf32>
    %45 = arith.mulf %21, %42 : vector<1x1024xf32>
    %46 = arith.mulf %45, %43 : vector<1x1024xf32>
    %47 = vector.shape_cast %46 : vector<1x1024xf32> to vector<1x1x1024xf32>
    %48 = arith.addf %44, %47 : vector<1x1x1024xf32>
    %c0_22 = arith.constant 0 : index
    %c0_23 = arith.constant 0 : index
    %c0_24 = arith.constant 0 : index
    %49 = vector.load %arg6[%c0_22, %c0_23, %c0_24] : memref<1x1x1024xf32, #tpu.memory_space<vmem>>, vector<1x1x1024xf32>
    tpu.vector_store %arg6[%c0_22, %c0_23, %c0_24], %48 {strides = array<i32>} : memref<1x1x1024xf32, #tpu.memory_space<vmem>>, vector<1x1x1024xf32>,
    return
  }
  func.func @transform_0(%arg0: i32, %arg1: i32) -> (i32, i32, i32) {
    %c0_i32 = arith.constant 0 : i32
    %c0_i32_0 = arith.constant 0 : i32
    return %arg0, %c0_i32, %arg1 : i32, i32, i32
  }
  func.func @transform_1(%arg0: i32, %arg1: i32) -> (i32, i32, i32) {
    %c0_i32 = arith.constant 0 : i32
    %c0_i32_0 = arith.constant 0 : i32
    return %arg0, %c0_i32, %arg1 : i32, i32, i32
  }
  func.func @transform_2(%arg0: i32, %arg1: i32) -> (i32, i32, i32) {
    %c0_i32 = arith.constant 0 : i32
    %c0_i32_0 = arith.constant 0 : i32
    return %arg0, %c0_i32, %arg1 : i32, i32, i32
  }
  func.func @transform_3(%arg0: i32, %arg1: i32) -> (i32, i32) {
    %c0_i32 = arith.constant 0 : i32
    %c0_i32_0 = arith.constant 0 : i32
    %c0_i32_1 = arith.constant 0 : i32
    return %c0_i32, %c0_i32_0 : i32, i32
  }
  func.func @transform_4(%arg0: i32, %arg1: i32) -> (i32, i32, i32) {
    %c0_i32 = arith.constant 0 : i32
    %c0_i32_0 = arith.constant 0 : i32
    %c0_i32_1 = arith.constant 0 : i32
    return %arg0, %c0_i32, %c0_i32_0 : i32, i32, i32
  }
}

</mosaic_0001>

<bundles_post_ra>
// kernel: pixelwise_cross_entropy_loss.1
= control target key start
LH: loop header
LB: loop body
LE: loop exit
PB: predicated region body
PF: predicated region fallthrough
CT: control target
= control target key end

     0   :  { %s1052_s15 = smov 0   ;;  %s1054_s16 = smov 0   ;;  %s1424_s0 = inlined_call_operand.vmem [shape: f32[2,4,1024], index: 0, kind: input, shape index: {}]   ;;  %s1425_s1 = inlined_call_operand.vmem [shape: s32[2,1,1024], index: 1, kind: input, shape index: {}]   ;;  %s1426_s2 = inlined_call_operand.vmem [shape: f32[2,1,1024], index: 2, kind: input, shape index: {}]   ;;  %s1427_s3 = inlined_call_operand.vmem [shape: f32[4,1], index: 3, kind: input, shape index: {}]   ;;  %s1428_s4 = inlined_call_operand.vmem [shape: f32[2,1,1024], index: 4, kind: output, shape index: {}]  }
   0x1   :  { %s1056_s17 = smov 0  }
   0x2 LB: > { %s26_s18 = sadd.s32 1, %s1019_s16  ;;  %p928_p0 = scmp.ge.s32.totalorder %s1023_s17, 1  ;;  %s1023_s17 = sphi %s1056_s17, %s14_s17   ;;  %s1019_s16 = sphi %s1054_s16, %s1435_s16   ;;  %s1015_s15 = sphi %s1052_s15, %s1434_s15  }
   0x3   : > { %p28_p1 = scmp.ge.s32.totalorder %s26_s18, 2  ;;  %p213_p2 = scmp.lt.s32.totalorder %s1023_s17, 3 }
   0x5   : > { %s1437_s18 = smov (%p28_p1, %s26_s18), 0  ;;  %p214_p3 = pnand %p928_p0, %p213_p2 }
   0x6   : > { %v301_v0 = vld [vmem:[%s1427_s3] sm:$0xf] (!%p214_p3)  ;;  %v1025_v1 = vmov (!%p214_p3), 0   ;;  %p259_p4 = scmp.lt.s32.totalorder (!%p214_p3), %s1015_s15, 1  ;;  %vm414_vm0 = vcmask (!%p214_p3), 1043456  }
   0x7   : > { %217 = sbr.rel (%p214_p3) target bundleno = 170 (0xaa), region = 36  ;;  %964 = vset.pattern.permute.xlu0 (!%p214_p3), %v1025_v1 }
   0x8   : > { %675 = vperm.xlu0 (!%p214_p3), %964, %v301_v0  }
   0xe   : > { %s1439_s15 = smov (!%p259_p4, %s1015_s15), 1 }
   0xf   : > { %s936_s21 = sshll.u32 %s1439_s15, 5  ;;  %s1142_s25 = sshll.u32 %s1439_s15, 3 }
  0x10   : > { %s266_s24 = scalar_lea.vmem %s1424_s0, %s936_s21  ;;  %s275_s28 = scalar_lea.vmem %s1425_s1, %s1142_s25 }
  0x11   : > { %v295_v2 = vld [vmem:[%s266_s24] sm:$0xff]  ;;  %v1079_v3 = vld [vmem:[%s266_s24 + $0x8] sm:$0xff]  ;;  %v1081_v5 = vld [vmem:[%s266_s24 + $0x10] sm:$0xff]  ;;  %s284_s5 = scalar_lea.vmem %s1426_s2, %s1142_s25  ;;  %s289_s8 = scalar_lea.vmem %s1428_s4, %s1142_s25 }
  0x12   : > { %v349_v4 = vcombine.high %v295_v2, %v295_v2  ;;  %v1085_v6 = vcombine.high %v1079_v3, %v1079_v3  ;;  %v1087_v7 = vld [vmem:[%s266_s24 + $0x18] sm:$0xff]  ;;  %v415_v8 = vsel %vm414_vm0, %v295_v2, -inf  ;;  %v1092_v9 = vcombine.high %v1081_v5, %v1081_v5 }
  0x13   : > { %v429_v11 = vsel %vm414_vm0, %v1079_v3, -inf  ;;  %v1099_v12 = vcombine.high %v1087_v7, %v1087_v7  ;;  %v416_v13 = vrot.slane %v415_v8, 4  ;;  %v443_v16 = vsel %vm414_vm0, %v1081_v5, -inf }
  0x14   : > { %v422_v10 = vsel %vm414_vm0, %v349_v4, -inf  ;;  %v436_v14 = vsel %vm414_vm0, %v1085_v6, -inf  ;;  %v430_v17 = vrot.slane %v429_v11, 4  ;;  %v450_v18 = vsel %vm414_vm0, %v1092_v9, -inf }
  0x15   : > { %v423_v15 = vrot.slane %v422_v10, 4  ;;  %v437_v19 = vrot.slane %v436_v14, 4  ;;  %v457_v20 = vsel %vm414_vm0, %v1087_v7, -inf  ;;  %v417_v21 = vmax.f32 %v415_v8, %v416_v13 }
  0x16   : > { %v444_v22 = vrot.slane %v443_v16, 4  ;;  %v464_v23 = vsel %vm414_vm0, %v1099_v12, -inf  ;;  %v451_v25 = vrot.slane %v450_v18, 4  ;;  %v431_v26 = vmax.f32 %v429_v11, %v430_v17 }
  0x17   : > { %v424_v24 = vmax.f32 %v422_v10, %v423_v15  ;;  %v458_v27 = vrot.slane %v457_v20, 4  ;;  %v438_v28 = vmax.f32 %v436_v14, %v437_v19  ;;  %v465_v29 = vrot.slane %v464_v23, 4 }
  0x18   : > { %v418_v30 = vrot.slane %v417_v21, 2  ;;  %v445_v31 = vmax.f32 %v443_v16, %v444_v22  ;;  %v452_v33 = vmax.f32 %v450_v18, %v451_v25  ;;  %v432_v34 = vrot.slane %v431_v26, 2 }
  0x19   : > { %v425_v32 = vrot.slane %v424_v24, 2  ;;  %v459_v35 = vmax.f32 %v457_v20, %v458_v27  ;;  %v439_v36 = vrot.slane %v438_v28, 2  ;;  %v466_v37 = vmax.f32 %v464_v23, %v465_v29 }
  0x1a   : > { %v419_v38 = vmax.f32 %v417_v21, %v418_v30  ;;  %v446_v39 = vrot.slane %v445_v31, 2  ;;  %v453_v41 = vrot.slane %v452_v33, 2  ;;  %v433_v42 = vmax.f32 %v431_v26, %v432_v34 }
  0x1b   : > { %v426_v40 = vmax.f32 %v424_v24, %v425_v32  ;;  %v460_v43 = vrot.slane %v459_v35, 2  ;;  %v440_v44 = vmax.f32 %v438_v28, %v439_v36  ;;  %v467_v45 = vrot.slane %v466_v37, 2 }
  0x1c   : > { %v420_v46 = vrot.slane %v419_v38, 1  ;;  %v447_v47 = vmax.f32 %v445_v31, %v446_v39  ;;  %v454_v49 = vmax.f32 %v452_v33, %v453_v41  ;;  %v434_v50 = vrot.slane %v433_v42, 1 }
  0x1d   : > { %v427_v48 = vrot.slane %v426_v40, 1  ;;  %v461_v51 = vmax.f32 %v459_v35, %v460_v43  ;;  %v441_v52 = vrot.slane %v440_v44, 1  ;;  %v468_v53 = vmax.f32 %v466_v37, %v467_v45  ;;  %v299_v35 = vld [vmem:[%s275_s28] sm:$0xff] }
  0x1e   : > { %v421_v54 = vmax.f32 %v419_v38, %v420_v46  ;;  %v448_v55 = vrot.slane %v447_v47, 1  ;;  %v455_v57 = vrot.slane %v454_v49, 1  ;;  %v435_v58 = vmax.f32 %v433_v42, %v434_v50 }
  0x1f   : > { %v428_v56 = vmax.f32 %v426_v40, %v427_v48  ;;  %v462_v59 = vrot.slane %v461_v51, 1  ;;  %v442_v60 = vmax.f32 %v440_v44, %v441_v52  ;;  %v469_v61 = vrot.slane %v468_v53, 1 }
  0x20   : > { %v449_v62 = vmax.f32 %v447_v47, %v448_v55  ;;  %v1111_v63 = vsub.f32 %v295_v2, %v421_v54  ;;  %v456_v0 = vmax.f32 %v454_v49, %v455_v57  ;;  %v1116_v10 = vsub.f32 %v1079_v3, %v435_v58 }
  0x21   : > { %v1113_v1 = vsub.f32 %v349_v4, %v428_v56  ;;  %v463_v8 = vmax.f32 %v461_v51, %v462_v59  ;;  %v470_v11 = vmax.f32 %v468_v53, %v469_v61  ;;  %v1119_v13 = vsub.f32 %v1085_v6, %v442_v60 }
  0x22   : > { %v1122_v14 = vsub.f32 %v1081_v5, %v449_v62  ;;  %v479_v15 = vmul.f32 1.442695, %v1111_v63  ;;  %v1126_v16 = vsub.f32 %v1092_v9, %v456_v0  ;;  %v483_v3 = vmul.f32 1.442695, %v1116_v10 }
  0x23   : > { %v481_v2 = vmul.f32 1.442695, %v1113_v1  ;;  %v1130_v4 = vsub.f32 %v1087_v7, %v463_v8  ;;  %v1134_v17 = vsub.f32 %v1099_v12, %v470_v11  ;;  %v485_v6 = vmul.f32 1.442695, %v1119_v13 }
  0x24   : > { %969 = vpow2.f32 %v479_v15  ;;  %v487_v5 = vmul.f32 1.442695, %v1122_v14  ;;  %v489_v9 = vmul.f32 1.442695, %v1126_v16  ;;  %v366_v12 = vlaneseq }
  0x25   : > { %971 = vpow2.f32 %v481_v2  ;;  %v491_v18 = vmul.f32 1.442695, %v1130_v4  ;;  %v493_v7 = vmul.f32 1.442695, %v1134_v17 }
  0x26   : > { %973 = vpow2.f32 %v483_v3  ;;  %v1144_v22 = vshrl.u32 %v366_v12, 7 }
  0x27   : > { %975 = vpow2.f32 %v485_v6 }
  0x28   : > { %977 = vpow2.f32 %v487_v5  ;;  %v368_v30 = vsub.s32 0, %v1144_v22  ;;  %v372_v31 = vsub.s32 1, %v1144_v22  ;;  %v376_v36 = vsub.s32 2, %v1144_v22 }
  0x29   : > { %979 = vpow2.f32 %v489_v9  ;;  %v380_v37 = vsub.s32 3, %v1144_v22  ;;  %v384_v40 = vsub.s32 4, %v1144_v22  ;;  %v388_v41 = vsub.s32 5, %v1144_v22 }
  0x2a   : > { %981 = vpow2.f32 %v491_v18  ;;  %v392_v44 = vsub.s32 6, %v1144_v22  ;;  %v396_v45 = vsub.s32 7, %v1144_v22  ;;  %v1168_v51 = vrot.slane %v299_v35, %v368_v30 }
  0x2b   : > { %983 = vpow2.f32 %v493_v7  ;;  %v1172_v54 = vrot.slane %v299_v35, %v372_v31  ;;  %v1176_v55 = vrot.slane %v299_v35, %v376_v36  ;;  %v1180_v58 = vrot.slane %v299_v35, %v380_v37 }
  0x2c   : > { %v1184_v59 = vrot.slane %v299_v35, %v384_v40  ;;  %v1188_v62 = vrot.slane %v299_v35, %v388_v41  ;;  %v1192_v0 = vrot.slane %v299_v35, %v392_v44  ;;  %v1196_v15 = vrot.slane %v299_v35, %v396_v45 }
  0x2d   : > { %vm601_vm1 = vcmp.eq.s32.totalorder %v1168_v51, %v1144_v22  ;;  %vm602_vm2 = vcmp.eq.s32.totalorder %v1172_v54, %v1144_v22  ;;  %vm603_vm3 = vcmp.eq.s32.totalorder %v1176_v55, %v1144_v22  ;;  %vm604_vm4 = vcmp.eq.s32.totalorder %v1180_v58, %v1144_v22 }
  0x2e   : > { %v970_v19 = vpop.eup %969  ;;  %vm605_vm5 = vcmp.eq.s32.totalorder %v1184_v59, %v1144_v22  ;;  %vm606_vm6 = vcmp.eq.s32.totalorder %v1188_v62, %v1144_v22  ;;  %vm607_vm7 = vcmp.eq.s32.totalorder %v1192_v0, %v1144_v22  ;;  %vm608_vm8 = vcmp.eq.s32.totalorder %v1196_v15, %v1144_v22 }
  0x2f   : > { %v972_v20 = vpop.eup %971  ;;  %v495_v24 = vsel %vm414_vm0, %v970_v19, 0.0  ;;  %v609_v19 = vsel %vm601_vm1, %v1111_v63, 0.0  ;;  %v613_v63 = vsel %vm605_vm5, %v1122_v14, 0.0  ;;  %v615_v14 = vsel %vm607_vm7, %v1130_v4, 0.0 }
  0x30   : > { %v974_v21 = vpop.eup %973  ;;  %v502_v26 = vsel %vm414_vm0, %v972_v20, 0.0  ;;  %v496_v32 = vrot.slane %v495_v24, 4 }
  0x31   : > { %v976_v23 = vpop.eup %975  ;;  %v509_v28 = vsel %vm414_vm0, %v974_v21, 0.0  ;;  %v503_v38 = vrot.slane %v502_v26, 4 }
  0x32   : > { %v978_v25 = vpop.eup %977  ;;  %v516_v33 = vsel %vm414_vm0, %v976_v23, 0.0  ;;  %v510_v42 = vrot.slane %v509_v28, 4  ;;  %v497_v48 = vadd.f32 %v496_v32, %v495_v24  ;;  %v610_v23 = vsel %vm602_vm2, %v1113_v1, 0.0 }
  0x33   : > { %v980_v27 = vpop.eup %979  ;;  %v523_v39 = vsel %vm414_vm0, %v978_v25, 0.0  ;;  %v517_v46 = vrot.slane %v516_v33, 4  ;;  %v504_v52 = vadd.f32 %v503_v38, %v502_v26  ;;  %v611_v24 = vsel %vm603_vm3, %v1116_v10, 0.0 }
  0x34   : > { %v982_v29 = vpop.eup %981  ;;  %v530_v43 = vsel %vm414_vm0, %v980_v27, 0.0  ;;  %v524_v49 = vrot.slane %v523_v39, 4  ;;  %v511_v56 = vadd.f32 %v510_v42, %v509_v28  ;;  %v498_v8 = vrot.slane %v497_v48, 2 }
  0x35   : > { %v984_v34 = vpop.eup %983  ;;  %v537_v47 = vsel %vm414_vm0, %v982_v29, 0.0  ;;  %v531_v53 = vrot.slane %v530_v43, 4  ;;  %v518_v60 = vadd.f32 %v517_v46, %v516_v33  ;;  %v505_v2 = vrot.slane %v504_v52, 2 }
  0x36   : > { %v544_v50 = vsel %vm414_vm0, %v984_v34, 0.0  ;;  %v538_v57 = vrot.slane %v537_v47, 4  ;;  %v525_v11 = vadd.f32 %v524_v49, %v523_v39  ;;  %v512_v6 = vrot.slane %v511_v56, 2 }
  0x37   : > { %v545_v61 = vrot.slane %v544_v50, 4  ;;  %v532_v3 = vadd.f32 %v531_v53, %v530_v43  ;;  %v519_v9 = vrot.slane %v518_v60, 2  ;;  %v499_v7 = vadd.f32 %v498_v8, %v497_v48 }
  0x38   : > { %v539_v5 = vadd.f32 %v538_v57, %v537_v47  ;;  %v526_v12 = vrot.slane %v525_v11, 2  ;;  %v506_v20 = vadd.f32 %v505_v2, %v504_v52  ;;  %v513_v25 = vadd.f32 %v512_v6, %v511_v56 }
  0x39   : > { %v546_v18 = vadd.f32 %v545_v61, %v544_v50  ;;  %v533_v21 = vrot.slane %v532_v3, 2  ;;  %v612_v27 = vsel %vm604_vm4, %v1119_v13, 0.0  ;;  %v520_v28 = vadd.f32 %v519_v9, %v518_v60 }
  0x3a   : > { %v540_v26 = vrot.slane %v539_v5, 2  ;;  %v614_v1 = vsel %vm606_vm6, %v1126_v16, 0.0  ;;  %v617_v10 = vsel %vm414_vm0, %v609_v19, 0.0  ;;  %v500_v32 = vrot.slane %v499_v7, 1 }
  0x3b   : > { %v547_v29 = vrot.slane %v546_v18, 2  ;;  %v527_v33 = vadd.f32 %v526_v12, %v525_v11  ;;  %v624_v34 = vsel %vm414_vm0, %v610_v23, 0.0  ;;  %v631_v13 = vsel %vm414_vm0, %v611_v24, 0.0 }
  0x3c   : > { %v507_v35 = vrot.slane %v506_v20, 1  ;;  %v534_v38 = vadd.f32 %v533_v21, %v532_v3  ;;  %v616_v16 = vsel %vm608_vm8, %v1134_v17, 0.0  ;;  %v514_v39 = vrot.slane %v513_v25, 1 }
  0x3d   : > { %v541_v42 = vadd.f32 %v540_v26, %v539_v5  ;;  %v618_v43 = vrot.slane %v617_v10, 4  ;;  %v638_v46 = vsel %vm414_vm0, %v612_v27, 0.0  ;;  %v521_v47 = vrot.slane %v520_v28, 1 }
  0x3e   : > { %v548_v48 = vadd.f32 %v547_v29, %v546_v18  ;;  %v625_v49 = vrot.slane %v624_v34, 4  ;;  %v632_v50 = vrot.slane %v631_v13, 4  ;;  %v501_v52 = vadd.f32 %v500_v32, %v499_v7 }
  0x3f   : > { %v528_v53 = vrot.slane %v527_v33, 1  ;;  %v645_v56 = vsel %vm414_vm0, %v613_v63, 0.0  ;;  %v652_v4 = vsel %vm414_vm0, %v614_v1, 0.0  ;;  %v508_v57 = vadd.f32 %v507_v35, %v506_v20 }
  0x40   : > { %v535_v60 = vrot.slane %v534_v38, 1  ;;  %v659_v61 = vsel %vm414_vm0, %v615_v14, 0.0  ;;  %v666_v17 = vsel %vm414_vm0, %v616_v16, 0.0  ;;  %v515_v8 = vadd.f32 %v514_v39, %v513_v25 }
  0x41   : > { %v542_v11 = vrot.slane %v541_v42, 1  ;;  %v619_v2 = vadd.f32 %v618_v43, %v617_v10  ;;  %v639_v3 = vrot.slane %v638_v46, 4  ;;  %v522_v6 = vadd.f32 %v521_v47, %v520_v28 }
  0x42   : > { %v549_v5 = vrot.slane %v548_v48, 1  ;;  %v646_v9 = vrot.slane %v645_v56, 4  ;;  %v653_v18 = vrot.slane %v652_v4, 4  ;;  %v529_v7 = vadd.f32 %v528_v53, %v527_v33 }
  0x43   : > { %985 = vlog2.f32 %v501_v52  ;;  %v660_v12 = vrot.slane %v659_v61, 4  ;;  %v667_v19 = vrot.slane %v666_v17, 4  ;;  %v536_v21 = vadd.f32 %v535_v60, %v534_v38 }
  0x44   : > { %987 = vlog2.f32 %v508_v57  ;;  %v626_v20 = vadd.f32 %v625_v49, %v624_v34  ;;  %v633_v23 = vadd.f32 %v632_v50, %v631_v13  ;;  %v543_v24 = vadd.f32 %v542_v11, %v541_v42  ;;  %v300_v50 = vld [vmem:[%s284_s5] sm:$0xff] }
  0x45   : > { %989 = vlog2.f32 %v515_v8  ;;  %v640_v26 = vadd.f32 %v639_v3, %v638_v46  ;;  %v550_v27 = vadd.f32 %v549_v5, %v548_v48  ;;  %v647_v25 = vadd.f32 %v646_v9, %v645_v56 }
  0x46   : > { %991 = vlog2.f32 %v522_v6  ;;  %v654_v63 = vadd.f32 %v653_v18, %v652_v4  ;;  %v620_v28 = vrot.slane %v619_v2, 2  ;;  %v661_v29 = vadd.f32 %v660_v12, %v659_v61 }
  0x47   : > { %993 = vlog2.f32 %v529_v7  ;;  %v668_v1 = vadd.f32 %v667_v19, %v666_v17  ;;  %v627_v10 = vrot.slane %v626_v20, 2  ;;  %v634_v32 = vrot.slane %v633_v23, 2 }
  0x48   : > { %995 = vlog2.f32 %v536_v21  ;;  %v641_v33 = vrot.slane %v640_v26, 2  ;;  %v648_v34 = vrot.slane %v647_v25, 2  ;;  %v655_v13 = vrot.slane %v654_v63, 2 }
  0x49   : > { %997 = vlog2.f32 %v543_v24  ;;  %v621_v35 = vadd.f32 %v620_v28, %v619_v2  ;;  %v662_v38 = vrot.slane %v661_v29, 2  ;;  %v669_v14 = vrot.slane %v668_v1, 2 }
  0x4a   : > { %999 = vlog2.f32 %v550_v27  ;;  %v628_v16 = vadd.f32 %v627_v10, %v626_v20  ;;  %v635_v39 = vadd.f32 %v634_v32, %v633_v23  ;;  %v642_v43 = vadd.f32 %v641_v33, %v640_v26 }
  0x4b   : > { %v649_v47 = vadd.f32 %v648_v34, %v647_v25  ;;  %v656_v48 = vadd.f32 %v655_v13, %v654_v63  ;;  %v622_v52 = vrot.slane %v621_v35, 1  ;;  %v663_v53 = vadd.f32 %v662_v38, %v661_v29 }
  0x4c   : > { %v670_v56 = vadd.f32 %v669_v14, %v668_v1  ;;  %v629_v57 = vrot.slane %v628_v16, 1  ;;  %v636_v60 = vrot.slane %v635_v39, 1  ;;  %v643_v17 = vrot.slane %v642_v43, 1 }
  0x4d   : > { %v986_v42 = vpop.eup %985  ;;  %v1260_v11 = vrot.slane %v300_v50, %v368_v30  ;;  %v650_v2 = vrot.slane %v649_v47, 1  ;;  %v657_v3 = vrot.slane %v656_v48, 1  ;;  %v1262_v5 = vadd.f32 %v622_v52, %v621_v35 }
  0x4e   : > { %v988_v46 = vpop.eup %987  ;;  %v664_v9 = vrot.slane %v663_v53, 1  ;;  %v671_v18 = vrot.slane %v670_v56, 1  ;;  %v1026_v7 = vmov 1966171168   ;;  %v1264_v21 = vmul.f32 0.6931472, %v986_v42 }
  0x4f   : > { %v990_v49 = vpop.eup %989  ;;  %v780_v12 = vunpack.c.l.s4 %v1026_v7  ;;  %v1266_v20 = vmul.f32 0.6931472, %v988_v46  ;;  %v1268_v23 = vadd.f32 %v629_v57, %v628_v16  ;;  %v1270_v24 = vadd.f32 %v636_v60, %v635_v39 }
  0x50   : > { %v992_v4 = vpop.eup %991  ;;  %v1272_v30 = vmul.f32 0.6931472, %v990_v49  ;;  %v1278_v25 = vadd.f32 %v643_v17, %v642_v43  ;;  %v1284_v29 = vadd.f32 %v650_v2, %v649_v47  ;;  %v1286_v1 = vadd.f32 %v657_v3, %v656_v48 }
  0x51   : > { %v994_v61 = vpop.eup %993  ;;  %v1274_v26 = vmul.f32 0.6931472, %v992_v4  ;;  %v1290_v32 = vadd.f32 %v664_v9, %v663_v53  ;;  %v1292_v33 = vadd.f32 %v671_v18, %v670_v56  ;;  %v781_v34 = vunpack.c.0.s8 %v780_v12 }
  0x52   : > { %v996_v8 = vpop.eup %995  ;;  %v1276_v27 = vmul.f32 0.6931472, %v994_v61  ;;  %v1296_v13 = vrot.slane %v300_v50, %v372_v31  ;;  %v1300_v35 = vrot.slane %v300_v50, %v376_v36  ;;  %v1304_v38 = vrot.slane %v300_v50, %v380_v37 }
  0x53   : > { %v998_v6 = vpop.eup %997  ;;  %v1280_v63 = vmul.f32 0.6931472, %v996_v8  ;;  %v1308_v14 = vrot.slane %v300_v50, %v384_v40  ;;  %v1312_v16 = vrot.slane %v300_v50, %v388_v41  ;;  %v1316_v31 = vrot.slane %v300_v50, %v392_v44 }
  0x54   : > { %v1000_v19 = vpop.eup %999  ;;  %v1282_v28 = vmul.f32 0.6931472, %v998_v6  ;;  %v1320_v36 = vrot.slane %v300_v50, %v396_v45  ;;  %v742_v37 = vsub.f32 %v1264_v21, %v1262_v5  ;;  %v743_v39 = vsub.f32 %v1266_v20, %v1268_v23 }
  0x55   : > { %v1288_v10 = vmul.f32 0.6931472, %v1000_v19  ;;  %v744_v40 = vsub.f32 %v1272_v30, %v1270_v24  ;;  %v1339_v47 = vsub.s32 %v781_v34, %v1144_v22  ;;  %v1430_v20 = vsub.f32 %v1276_v27, %v1284_v29 }
  0x56   : > { %v1431_v24 = vsub.f32 %v1280_v63, %v1286_v1 }
  0x87   : > { %v676_v42 = vpop.permute.xlu0 %675 }
  0x88   : > { %v678_v48 = vsel %vm601_vm1, %v676_v42, 0.0  ;;  %v679_v49 = vsel %vm602_vm2, %v676_v42, 0.0  ;;  %v680_v50 = vsel %vm603_vm3, %v676_v42, 0.0  ;;  %v681_v52 = vsel %vm604_vm4, %v676_v42, 0.0 }
  0x89   : > { %v682_v53 = vsel %vm605_vm5, %v676_v42, 0.0  ;;  %v683_v51 = vsel %vm606_vm6, %v676_v42, 0.0  ;;  %v684_v54 = vsel %vm607_vm7, %v676_v42, 0.0  ;;  %v685_v55 = vsel %vm608_vm8, %v676_v42, 0.0 }
  0x8a   : > { %v686_v56 = vsel %vm414_vm0, %v678_v48, 0.0  ;;  %v693_v58 = vsel %vm414_vm0, %v679_v49, 0.0  ;;  %v700_v4 = vsel %vm414_vm0, %v680_v50, 0.0  ;;  %v707_v59 = vsel %vm414_vm0, %v681_v52, 0.0 }
  0x8b   : > { %v687_v57 = vrot.slane %v686_v56, 4  ;;  %v694_v60 = vrot.slane %v693_v58, 4  ;;  %v701_v62 = vrot.slane %v700_v4, 4  ;;  %v708_v61 = vrot.slane %v707_v59, 4 }
  0x8c   : > { %v714_v17 = vsel %vm414_vm0, %v682_v53, 0.0  ;;  %v721_v0 = vsel %vm414_vm0, %v683_v51, 0.0  ;;  %v728_v8 = vsel %vm414_vm0, %v684_v54, 0.0  ;;  %v735_v22 = vsel %vm414_vm0, %v685_v55, 0.0 }
  0x8d   : > { %v688_v15 = vadd.f32 %v687_v57, %v686_v56  ;;  %v695_v2 = vadd.f32 %v694_v60, %v693_v58  ;;  %v702_v3 = vadd.f32 %v701_v62, %v700_v4  ;;  %v709_v6 = vadd.f32 %v708_v61, %v707_v59 }
  0x8e   : > { %v715_v9 = vrot.slane %v714_v17, 4  ;;  %v722_v18 = vrot.slane %v721_v0, 4  ;;  %v729_v7 = vrot.slane %v728_v8, 4  ;;  %v736_v12 = vrot.slane %v735_v22, 4 }
  0x8f   : > { %v689_v19 = vrot.slane %v688_v15, 2  ;;  %v696_v34 = vrot.slane %v695_v2, 2  ;;  %v703_v42 = vrot.slane %v702_v3, 2  ;;  %v710_v48 = vrot.slane %v709_v6, 2 }
  0x90   : > { %v716_v49 = vadd.f32 %v715_v9, %v714_v17  ;;  %v723_v50 = vadd.f32 %v722_v18, %v721_v0  ;;  %v730_v52 = vadd.f32 %v729_v7, %v728_v8  ;;  %v737_v53 = vadd.f32 %v736_v12, %v735_v22 }
  0x91   : > { %v690_v51 = vadd.f32 %v689_v19, %v688_v15  ;;  %v697_v54 = vadd.f32 %v696_v34, %v695_v2  ;;  %v704_v46 = vadd.f32 %v703_v42, %v702_v3  ;;  %v711_v55 = vadd.f32 %v710_v48, %v709_v6 }
  0x92   : > { %v717_v56 = vrot.slane %v716_v49, 2  ;;  %v724_v58 = vrot.slane %v723_v50, 2  ;;  %v731_v4 = vrot.slane %v730_v52, 2  ;;  %v738_v59 = vrot.slane %v737_v53, 2 }
  0x93   : > { %v691_v57 = vrot.slane %v690_v51, 1  ;;  %v698_v60 = vrot.slane %v697_v54, 1  ;;  %v705_v62 = vrot.slane %v704_v46, 1  ;;  %v712_v61 = vrot.slane %v711_v55, 1 }
  0x94   : > { %v718_v43 = vadd.f32 %v717_v56, %v716_v49  ;;  %v725_v45 = vadd.f32 %v724_v58, %v723_v50  ;;  %v732_v44 = vadd.f32 %v731_v4, %v730_v52  ;;  %v739_v41 = vadd.f32 %v738_v59, %v737_v53 }
  0x95   : > { %v692_v17 = vadd.f32 %v691_v57, %v690_v51  ;;  %v699_v0 = vadd.f32 %v698_v60, %v697_v54  ;;  %v706_v8 = vadd.f32 %v705_v62, %v704_v46  ;;  %v713_v22 = vadd.f32 %v712_v61, %v711_v55 }
  0x96   : > { %v719_v15 = vrot.slane %v718_v43, 1  ;;  %v726_v2 = vrot.slane %v725_v45, 1  ;;  %v733_v3 = vrot.slane %v732_v44, 1  ;;  %v740_v6 = vrot.slane %v739_v41, 1 }
  0x97   : > { %v751_v9 = vmul.f32 %v692_v17, %v1260_v11  ;;  %v752_v18 = vmul.f32 %v699_v0, %v1296_v13  ;;  %v753_v7 = vmul.f32 %v706_v8, %v1300_v35  ;;  %v754_v12 = vmul.f32 %v713_v22, %v1304_v38 }
  0x98   : > { %v720_v19 = vadd.f32 %v719_v15, %v718_v43  ;;  %v727_v34 = vadd.f32 %v726_v2, %v725_v45  ;;  %v734_v42 = vadd.f32 %v733_v3, %v732_v44  ;;  %v741_v48 = vadd.f32 %v740_v6, %v739_v41 }
  0x99   : > { %v759_v46 = vmul.f32 %v751_v9, %v742_v37  ;;  %v760_v49 = vmul.f32 %v752_v18, %v743_v39  ;;  %v761_v11 = vmul.f32 %v753_v7, %v744_v40  ;;  %v1429_v13 = vsub.f32 %v1274_v26, %v1278_v25 }
  0x9a   : > { %v755_v38 = vmul.f32 %v720_v19, %v1308_v14  ;;  %v756_v41 = vmul.f32 %v727_v34, %v1312_v16  ;;  %v757_v44 = vmul.f32 %v734_v42, %v1316_v31  ;;  %v758_v5 = vmul.f32 %v741_v48, %v1320_v36 }
  0x9b   : > { %v762_v35 = vmul.f32 %v754_v12, %v1429_v13  ;;  %v775_v21 = vcombine.low %v759_v46, %v760_v49  ;;  %v1432_v26 = vsub.f32 %v1282_v28, %v1290_v32  ;;  %v1433_v14 = vsub.f32 %v1288_v10, %v1292_v33 }
  0x9c   : > { %v763_v23 = vmul.f32 %v755_v38, %v1430_v20  ;;  %v764_v30 = vmul.f32 %v756_v41, %v1431_v24 }
  0x9d   : > { %v776_v37 = vcombine.low %v761_v11, %v762_v35  ;;  %v765_v25 = vmul.f32 %v757_v44, %v1432_v26  ;;  %v766_v16 = vmul.f32 %v758_v5, %v1433_v14  ;;  %v785_v31 = vrot.slane %v775_v21, %v1339_v47 }
  0x9e   : > { %v777_v39 = vcombine.low %v763_v23, %v764_v30 }
  0x9f   : > { %v792_v36 = vrot.slane %v776_v37, %v1339_v47  ;;  %v778_v27 = vcombine.low %v765_v25, %v766_v16 }
  0xa0   : > { %v799_v40 = vrot.slane %v777_v39, %v1339_v47 }
  0xa1   : > { %v807_v29 = vcombine.low %v785_v31, %v792_v36  ;;  %v806_v63 = vrot.slane %v778_v27, %v1339_v47 }
  0xa3   : > { %v808_v1 = vcombine.low %v799_v40, %v806_v63  ;;  %v815_v45 = vrot.slane %v807_v29, %v1339_v47 }
  0xa5   : > { %v822_v28 = vrot.slane %v808_v1, %v1339_v47 }
  0xa7   : > { %v823_v32 = vcombine.low %v815_v45, %v822_v28 }
  0xa9   : > { %826 = vst [vmem:[%s289_s8] sm:$0xff] %v823_v32 }
  0xaa PF: > { %s14_s17 = sadd.s32 1, %s1023_s17   ;;  %s1434_s15 = smov %s1019_s16 }
  0xab   : > { %p11_p5 = scmp.ge.s32.totalorder %s14_s17, 4   ;;  %s1435_s16 = smov %s1437_s18 }
  0xad   :  { %13 = sbr.rel (!%p11_p5) target bundleno = 2 (0x2), region = 76 }

</bundles_post_ra>
